<compile_context>
chip_gen: v7x
topology: tpu7x:2x2x1
jax: 0.10.0
libtpu: 0.0.40
codegen_flags: <defaults>
</compile_context>

<pallas_src>
import functools

import jax
import jax.numpy as jnp
from jax.experimental import pallas as pl
from jax.experimental.pallas import tpu as pltpu


def _round_up(x, m):
    return ((x + m - 1) // m) * m


def _smooth_conv_kernel(x_ref, w_ref, o_ref, xp_scr, col_scr, *, k, W, HW,
                        block_n, left):
    # x_ref:   (block_n, C_in_pad, HW)       flattened, channel-padded images
    # w_ref:   (C_out, k*k*C_in_pad)         im2col-ordered weight (resident)
    # o_ref:   (block_n, C_out, HW)          flattened outputs (lane-dense)
    # xp_scr:  (C_in_pad, left + HW + pad_r) flat zero-padded one-image buffer
    # col_scr: (k*k*C_in_pad, block_n*HW)    batched im2col buffer
    p = (k - 1) // 2
    c_in_pad = x_ref.shape[1]
    w_padded = xp_scr.shape[1]

    # Horizontal-wrap masks (one per tap column offset), hoisted and shared by
    # all images / taps: cheap VPU work, no per-iteration broadcasts.
    col = jax.lax.broadcasted_iota(jnp.int32, (c_in_pad, HW), 1) % W
    col_ok = {}
    for dx in range(k):
        ox = dx - p
        if ox != 0:
            col_ok[ox] = (col + ox >= 0) & (col + ox < W)

    # Re-zero only the pad strips every step (a couple of vregs).  Scratch is
    # uninitialized and persists, but a program_id==0 gate would leave the
    # second TensorCore's strips undefined under 'parallel' megacore sharding.
    if left > 0:
        xp_scr[:, :left] = jnp.zeros((c_in_pad, left), xp_scr.dtype)
    right = w_padded - left - HW
    if right > 0:
        xp_scr[:, left + HW:] = jnp.zeros((c_in_pad, right), xp_scr.dtype)

    for b in range(block_n):             # small static unroll; taps are
        # Lane-aligned interior write: offset `left` is a multiple of 128 and
        # the full c_in_pad sublane tile is written -> unmasked full tiles.
        xp_scr[:, left:left + HW] = x_ref[b]

        # im2col: tap t = dy*k + dx holds x[ci, h+dy-p, w+dx-p] (0 outside the
        # image) for every output position j = h*W + w.  With the flat zero
        # padding this is the lane slice starting at left + (dy-p)*W + (dx-p);
        # only horizontal wrap into the neighbouring image row needs masking.
        for dy in range(k):
            for dx in range(k):
                ox = dx - p
                delta = (dy - p) * W + ox
                sh = xp_scr[:, left + delta:left + delta + HW]
                if ox != 0:
                    sh = jnp.where(col_ok[ox], sh, 0.0)
                t = dy * k + dx
                # (8,128)-aligned full-tile store: row offset t*c_in_pad is a
                # multiple of 8, lane offset b*HW a multiple of 128.
                col_scr[t * c_in_pad:(t + 1) * c_in_pad,
                        b * HW:(b + 1) * HW] = sh

    # ONE MXU contraction over all taps, channels and images in the block.
    acc = jnp.dot(w_ref[...], col_scr[...], preferred_element_type=jnp.float32)
    for b in range(block_n):
        # Lane-aligned (C_out, HW) slices of the result.
        o_ref[b] = acc[:, b * HW:(b + 1) * HW].astype(o_ref.dtype)


def _num_tensorcores():
    # v7x exposes 2 TensorCores per chip (megacore); v5e/v6e have 1.
    try:
        kind = jax.devices()[0].device_kind.lower()
        if "v7" in kind:
            return 2
    except Exception:
        pass
    return 1


def _vmem_budget_bytes():
    try:
        return int(pltpu.get_tpu_info().vmem_capacity_bytes) // 2
    except Exception:
        return 32 << 20


def _pick_block_n(N, per_image_bytes, fixed_bytes, budget, two_cores):
    divisors = [d for d in range(1, N + 1) if N % d == 0]
    feasible = [d for d in divisors
                if fixed_bytes + d * per_image_bytes <= budget]
    if not feasible:
        feasible = [1]
    if two_cores and N >= 2:
        # Keep >= 2 grid steps so dimension_semantics=("parallel",) can feed
        # both v7x TensorCores.
        multi = [d for d in feasible if N // d >= 2]
        if multi:
            return max(multi)
    # Single-TensorCore chip (v5e/v6e): one grid step avoids the ~0.35us
    # per-step overhead that dominates at small problem sizes.
    return max(feasible)


def smooth_conv2d(x, weight, *, block_n=None):
    """SmoothConv2D.forward:  F.conv2d(x, weight, padding=(k-1)//2).

    x:      (N, C_in, H, W)
    weight: (C_out, C_in, k, k)   -- the module buffer (ones / k**2)
    returns (N, C_out, H, W)
    """
    N, C_in, H, W = x.shape
    C_out, C_in_w, kh, kw = weight.shape
    assert C_in == C_in_w and kh == kw
    k = kh
    assert k % 2 == 1, "kernel_size for smooth_conv must be odd"
    p = (k - 1) // 2
    HW = H * W
    pad = p * W + p                       # largest |flat tap shift|
    itemsize = jnp.dtype(x.dtype).itemsize

    # Sublane-pad the input channels so every tile touched in the kernel is
    # (8,128)-aligned (zero channels contribute nothing to the contraction).
    sub = 8 if itemsize >= 4 else (16 if itemsize == 2 else 32)
    C_in_pad = _round_up(C_in, sub)

    # Flat-pad buffer geometry: interior at a lane-tile-aligned offset.
    left = _round_up(pad, 128) if pad > 0 else 0
    W_padded = _round_up(left + HW + pad, 128)

    # Per-grid-step VMEM need (double-buffered blocks + scratch).
    in_img = C_in_pad * HW * itemsize
    out_img = C_out * HW * itemsize
    col_img = k * k * C_in_pad * HW * itemsize
    per_image = 2 * (in_img + out_img) + col_img
    fixed = (C_in_pad * W_padded * itemsize
             + 2 * C_out * k * k * C_in_pad * itemsize)
    budget = _vmem_budget_bytes()

    if block_n is None:
        block_n = _pick_block_n(N, per_image, fixed, budget,
                                two_cores=_num_tensorcores() >= 2)
    assert N % block_n == 0
    grid_n = N // block_n
    need = fixed + block_n * per_image
    vmem_limit = int(min(max(2 * need, 32 << 20),
                         max(budget, need + (1 << 20))))

    # Free contiguous reshape + tiny one-time channel pad / weight reorder.
    x_flat = x.reshape(N, C_in, HW)
    if C_in_pad != C_in:
        x_flat = jnp.pad(x_flat, ((0, 0), (0, C_in_pad - C_in), (0, 0)))
    # w2[co, (dy*k + dx)*C_in_pad + ci] = weight[co, ci, dy, dx]  (0 for pad ci)
    w_t = jnp.transpose(weight, (0, 2, 3, 1))          # (C_out, k, k, C_in)
    if C_in_pad != C_in:
        w_t = jnp.pad(w_t, ((0, 0), (0, 0), (0, 0), (0, C_in_pad - C_in)))
    w2 = w_t.reshape(C_out, k * k * C_in_pad)

    kernel = functools.partial(_smooth_conv_kernel, k=k, W=W, HW=HW,
                               block_n=block_n, left=left)

    # TODO(synk): at real resolutions add an H-tiling grid axis with a p-row
    # halo ('arbitrary') so xp_scr/col_scr stay inside v7x's 64 MiB VMEM.
    out_flat = pl.pallas_call(
        kernel,
        out_shape=jax.ShapeDtypeStruct((N, C_out, HW), x.dtype),
        grid_spec=pltpu.PrefetchScalarGridSpec(
            num_scalar_prefetch=0,
            grid=(grid_n,),
            in_specs=[
                pl.BlockSpec((block_n, C_in_pad, HW), lambda n: (n, 0, 0)),
                # full weight, resident in VMEM across the whole grid
                pl.BlockSpec((C_out, k * k * C_in_pad), lambda n: (0, 0)),
            ],
            out_specs=pl.BlockSpec((block_n, C_out, HW), lambda n: (n, 0, 0)),
            scratch_shapes=[
                pltpu.VMEM((C_in_pad, W_padded), x.dtype),
                pltpu.VMEM((k * k * C_in_pad, block_n * HW), x.dtype),
            ],
        ),
        compiler_params=pltpu.CompilerParams(
            dimension_semantics=("parallel",),
            vmem_limit_bytes=vmem_limit),
    )(x_flat, w2)

    return out_flat.reshape(N, C_out, H, W)


if __name__ == "__main__":
    # Module ctor args: SmoothConv2D(in_channels=4, out_channels=6, kernel_size=3)
    in_channels = 4      # -> conv OUTPUT channel count (F.conv2d convention)
    out_channels = 6     # -> conv INPUT channel count
    kernel_size = 3

    # Buffer exactly as in __init__: ones / k**2, shape (in, out, k, k).
    weight = jnp.ones((in_channels, out_channels, kernel_size, kernel_size),
                      dtype=jnp.float32) / (kernel_size ** 2)

    N, H, W = 2, 16, 16
    x = jax.random.normal(jax.random.PRNGKey(0),
                          (N, out_channels, H, W), dtype=jnp.float32)

    out = jax.block_until_ready(smooth_conv2d(x, weight))

    # Reference: same semantics as F.conv2d(x, weight, padding=(k-1)//2).
    p = (kernel_size - 1) // 2
    ref = jax.lax.conv_general_dilated(
        x, weight, window_strides=(1, 1), padding=[(p, p), (p, p)],
        dimension_numbers=("NCHW", "OIHW", "NCHW"))

    assert out.shape == (N, in_channels, H, W)
    assert jnp.allclose(out, ref, atol=1e-5, rtol=1e-5)

    print("KERNEL_OK")
</pallas_src>

<mosaic_0001>
module attributes {stable_mosaic.version = 11 : i64} {
  func.func @_smooth_conv_kernel(%arg0: i32, %arg1: memref<2x8x256xf32, #tpu.memory_space<vmem>>, %arg2: memref<4x72xf32, #tpu.memory_space<vmem>>, %arg3: memref<2x4x256xf32, #tpu.memory_space<vmem>>, %arg4: memref<8x512xf32, #tpu.memory_space<vmem>>, %arg5: memref<72x512xf32, #tpu.memory_space<vmem>>) attributes {dimension_semantics = [#tpu.dimension_semantics<parallel>], iteration_bounds = array<i64: 1>, scalar_prefetch = 0 : i64, scratch_operands = 2 : i64, tpu.core_type = #tpu.core_type<tc>, window_params = [{transform_indices = @transform_0, window_bounds = array<i64: 2, 8, 256>}, {pipeline_mode = #tpu.pipeline_mode<synchronous>, transform_indices = @transform_1, window_bounds = array<i64: 4, 72>}, {transform_indices = @transform_2, window_bounds = array<i64: 2, 4, 256>}]} {
    %0 = tpu.iota {dimensions = array<i32: 1>} : vector<8x256xi32>
    %c16_i32 = arith.constant 16 : i32
    %c0_i32 = arith.constant 0 : i32
    %1 = arith.cmpi eq, %c16_i32, %c0_i32 : i32
    %c1_i32 = arith.constant 1 : i32
    %2 = arith.select %1, %c1_i32, %c16_i32 : i32
    %3 = vector.broadcast %2 : i32 to vector<8x256xi32>
    %4 = arith.remsi %0, %3 : vector<8x256xi32>
    %c0_i32_0 = arith.constant 0 : i32
    %5 = vector.broadcast %c0_i32_0 : i32 to vector<8x256xi32>
    %6 = arith.cmpi ne, %4, %5 : vector<8x256xi32>
    %c0_i32_1 = arith.constant 0 : i32
    %7 = vector.broadcast %c0_i32_1 : i32 to vector<8x256xi32>
    %8 = arith.cmpi slt, %4, %7 : vector<8x256xi32>
    %c0_i32_2 = arith.constant 0 : i32
    %9 = arith.cmpi slt, %2, %c0_i32_2 : i32
    %10 = vector.broadcast %9 : i1 to vector<8x256xi1>
    %11 = vector.broadcast %10 : vector<8x256xi1> to vector<8x256xi1>
    %12 = arith.xori %8, %11 : vector<8x256xi1>
    %13 = arith.andi %12, %6 : vector<8x256xi1>
    %14 = vector.broadcast %2 : i32 to vector<8x256xi32>
    %15 = arith.addi %4, %14 : vector<8x256xi32>
    %16 = arith.select %13, %15, %4 : vector<8x256xi1>, vector<8x256xi32>
    %c-1_i32 = arith.constant -1 : i32
    %17 = vector.broadcast %c-1_i32 : i32 to vector<8x256xi32>
    %18 = arith.addi %16, %17 : vector<8x256xi32>
    %c0_i32_3 = arith.constant 0 : i32
    %19 = vector.broadcast %c0_i32_3 : i32 to vector<8x256xi32>
    %20 = arith.cmpi sge, %18, %19 : vector<8x256xi32>
    %c-1_i32_4 = arith.constant -1 : i32
    %21 = vector.broadcast %c-1_i32_4 : i32 to vector<8x256xi32>
    %22 = arith.addi %16, %21 : vector<8x256xi32>
    %c16_i32_5 = arith.constant 16 : i32
    %23 = vector.broadcast %c16_i32_5 : i32 to vector<8x256xi32>
    %24 = arith.cmpi slt, %22, %23 : vector<8x256xi32>
    %25 = arith.andi %20, %24 : vector<8x256xi1>
    %c1_i32_6 = arith.constant 1 : i32
    %26 = vector.broadcast %c1_i32_6 : i32 to vector<8x256xi32>
    %27 = arith.addi %16, %26 : vector<8x256xi32>
    %c0_i32_7 = arith.constant 0 : i32
    %28 = vector.broadcast %c0_i32_7 : i32 to vector<8x256xi32>
    %29 = arith.cmpi sge, %27, %28 : vector<8x256xi32>
    %c1_i32_8 = arith.constant 1 : i32
    %30 = vector.broadcast %c1_i32_8 : i32 to vector<8x256xi32>
    %31 = arith.addi %16, %30 : vector<8x256xi32>
    %c16_i32_9 = arith.constant 16 : i32
    %32 = vector.broadcast %c16_i32_9 : i32 to vector<8x256xi32>
    %33 = arith.cmpi slt, %31, %32 : vector<8x256xi32>
    %34 = arith.andi %29, %33 : vector<8x256xi1>
    %cst = arith.constant 0.000000e+00 : f32
    %35 = vector.broadcast %cst : f32 to vector<8x128xf32>
    %c0 = arith.constant 0 : index
    %c0_10 = arith.constant 0 : index
    %36 = vector.load %arg4[%c0, %c0_10] : memref<8x512xf32, #tpu.memory_space<vmem>>, vector<8x128xf32>
    tpu.vector_store %arg4[%c0, %c0_10], %35 {strides = array<i32>} : memref<8x512xf32, #tpu.memory_space<vmem>>, vector<8x128xf32>,
    %cst_11 = arith.constant 0.000000e+00 : f32
    %37 = vector.broadcast %cst_11 : f32 to vector<8x128xf32>
    %c0_12 = arith.constant 0 : index
    %c384 = arith.constant 384 : index
    %38 = vector.load %arg4[%c0_12, %c384] : memref<8x512xf32, #tpu.memory_space<vmem>>, vector<8x128xf32>
    tpu.vector_store %arg4[%c0_12, %c384], %37 {strides = array<i32>} : memref<8x512xf32, #tpu.memory_space<vmem>>, vector<8x128xf32>,
    %c0_13 = arith.constant 0 : index
    %c0_14 = arith.constant 0 : index
    %c0_15 = arith.constant 0 : index
    %39 = vector.load %arg1[%c0_13, %c0_14, %c0_15] : memref<2x8x256xf32, #tpu.memory_space<vmem>>, vector<1x8x256xf32>
    %40 = vector.shape_cast %39 : vector<1x8x256xf32> to vector<8x256xf32>
    %c0_16 = arith.constant 0 : index
    %c128 = arith.constant 128 : index
    %41 = vector.load %arg4[%c0_16, %c128] : memref<8x512xf32, #tpu.memory_space<vmem>>, vector<8x256xf32>
    tpu.vector_store %arg4[%c0_16, %c128], %40 {strides = array<i32>} : memref<8x512xf32, #tpu.memory_space<vmem>>, vector<8x256xf32>,
    %c0_17 = arith.constant 0 : index
    %c111 = arith.constant 111 : index
    %42 = vector.load %arg4[%c0_17, %c111] : memref<8x512xf32, #tpu.memory_space<vmem>>, vector<8x256xf32>
    %cst_18 = arith.constant 0.000000e+00 : f32
    %43 = vector.broadcast %cst_18 : f32 to vector<8x256xf32>
    %44 = arith.select %25, %42, %43 : vector<8x256xi1>, vector<8x256xf32>
    %c0_19 = arith.constant 0 : index
    %c0_20 = arith.constant 0 : index
    %45 = vector.load %arg5[%c0_19, %c0_20] : memref<72x512xf32, #tpu.memory_space<vmem>>, vector<8x256xf32>
    tpu.vector_store %arg5[%c0_19, %c0_20], %44 {strides = array<i32>} : memref<72x512xf32, #tpu.memory_space<vmem>>, vector<8x256xf32>,
    %c0_21 = arith.constant 0 : index
    %c112 = arith.constant 112 : index
    %46 = vector.load %arg4[%c0_21, %c112] : memref<8x512xf32, #tpu.memory_space<vmem>>, vector<8x256xf32>
    %c8 = arith.constant 8 : index
    %c0_22 = arith.constant 0 : index
    %47 = vector.load %arg5[%c8, %c0_22] : memref<72x512xf32, #tpu.memory_space<vmem>>, vector<8x256xf32>
    tpu.vector_store %arg5[%c8, %c0_22], %46 {strides = array<i32>} : memref<72x512xf32, #tpu.memory_space<vmem>>, vector<8x256xf32>,
    %c0_23 = arith.constant 0 : index
    %c113 = arith.constant 113 : index
    %48 = vector.load %arg4[%c0_23, %c113] : memref<8x512xf32, #tpu.memory_space<vmem>>, vector<8x256xf32>
    %cst_24 = arith.constant 0.000000e+00 : f32
    %49 = vector.broadcast %cst_24 : f32 to vector<8x256xf32>
    %50 = arith.select %34, %48, %49 : vector<8x256xi1>, vector<8x256xf32>
    %c16 = arith.constant 16 : index
    %c0_25 = arith.constant 0 : index
    %51 = vector.load %arg5[%c16, %c0_25] : memref<72x512xf32, #tpu.memory_space<vmem>>, vector<8x256xf32>
    tpu.vector_store %arg5[%c16, %c0_25], %50 {strides = array<i32>} : memref<72x512xf32, #tpu.memory_space<vmem>>, vector<8x256xf32>,
    %c0_26 = arith.constant 0 : index
    %c127 = arith.constant 127 : index
    %52 = vector.load %arg4[%c0_26, %c127] : memref<8x512xf32, #tpu.memory_space<vmem>>, vector<8x256xf32>
    %cst_27 = arith.constant 0.000000e+00 : f32
    %53 = vector.broadcast %cst_27 : f32 to vector<8x256xf32>
    %54 = arith.select %25, %52, %53 : vector<8x256xi1>, vector<8x256xf32>
    %c24 = arith.constant 24 : index
    %c0_28 = arith.constant 0 : index
    %55 = vector.load %arg5[%c24, %c0_28] : memref<72x512xf32, #tpu.memory_space<vmem>>, vector<8x256xf32>
    tpu.vector_store %arg5[%c24, %c0_28], %54 {strides = array<i32>} : memref<72x512xf32, #tpu.memory_space<vmem>>, vector<8x256xf32>,
    %c0_29 = arith.constant 0 : index
    %c128_30 = arith.constant 128 : index
    %56 = vector.load %arg4[%c0_29, %c128_30] : memref<8x512xf32, #tpu.memory_space<vmem>>, vector<8x256xf32>
    %c32 = arith.constant 32 : index
    %c0_31 = arith.constant 0 : index
    %57 = vector.load %arg5[%c32, %c0_31] : memref<72x512xf32, #tpu.memory_space<vmem>>, vector<8x256xf32>
    tpu.vector_store %arg5[%c32, %c0_31], %56 {strides = array<i32>} : memref<72x512xf32, #tpu.memory_space<vmem>>, vector<8x256xf32>,
    %c0_32 = arith.constant 0 : index
    %c129 = arith.constant 129 : index
    %58 = vector.load %arg4[%c0_32, %c129] : memref<8x512xf32, #tpu.memory_space<vmem>>, vector<8x256xf32>
    %cst_33 = arith.constant 0.000000e+00 : f32
    %59 = vector.broadcast %cst_33 : f32 to vector<8x256xf32>
    %60 = arith.select %34, %58, %59 : vector<8x256xi1>, vector<8x256xf32>
    %c40 = arith.constant 40 : index
    %c0_34 = arith.constant 0 : index
    %61 = vector.load %arg5[%c40, %c0_34] : memref<72x512xf32, #tpu.memory_space<vmem>>, vector<8x256xf32>
    tpu.vector_store %arg5[%c40, %c0_34], %60 {strides = array<i32>} : memref<72x512xf32, #tpu.memory_space<vmem>>, vector<8x256xf32>,
    %c0_35 = arith.constant 0 : index
    %c143 = arith.constant 143 : index
    %62 = vector.load %arg4[%c0_35, %c143] : memref<8x512xf32, #tpu.memory_space<vmem>>, vector<8x256xf32>
    %cst_36 = arith.constant 0.000000e+00 : f32
    %63 = vector.broadcast %cst_36 : f32 to vector<8x256xf32>
    %64 = arith.select %25, %62, %63 : vector<8x256xi1>, vector<8x256xf32>
    %c48 = arith.constant 48 : index
    %c0_37 = arith.constant 0 : index
    %65 = vector.load %arg5[%c48, %c0_37] : memref<72x512xf32, #tpu.memory_space<vmem>>, vector<8x256xf32>
    tpu.vector_store %arg5[%c48, %c0_37], %64 {strides = array<i32>} : memref<72x512xf32, #tpu.memory_space<vmem>>, vector<8x256xf32>,
    %c0_38 = arith.constant 0 : index
    %c144 = arith.constant 144 : index
    %66 = vector.load %arg4[%c0_38, %c144] : memref<8x512xf32, #tpu.memory_space<vmem>>, vector<8x256xf32>
    %c56 = arith.constant 56 : index
    %c0_39 = arith.constant 0 : index
    %67 = vector.load %arg5[%c56, %c0_39] : memref<72x512xf32, #tpu.memory_space<vmem>>, vector<8x256xf32>
    tpu.vector_store %arg5[%c56, %c0_39], %66 {strides = array<i32>} : memref<72x512xf32, #tpu.memory_space<vmem>>, vector<8x256xf32>,
    %c0_40 = arith.constant 0 : index
    %c145 = arith.constant 145 : index
    %68 = vector.load %arg4[%c0_40, %c145] : memref<8x512xf32, #tpu.memory_space<vmem>>, vector<8x256xf32>
    %cst_41 = arith.constant 0.000000e+00 : f32
    %69 = vector.broadcast %cst_41 : f32 to vector<8x256xf32>
    %70 = arith.select %34, %68, %69 : vector<8x256xi1>, vector<8x256xf32>
    %c64 = arith.constant 64 : index
    %c0_42 = arith.constant 0 : index
    %71 = vector.load %arg5[%c64, %c0_42] : memref<72x512xf32, #tpu.memory_space<vmem>>, vector<8x256xf32>
    tpu.vector_store %arg5[%c64, %c0_42], %70 {strides = array<i32>} : memref<72x512xf32, #tpu.memory_space<vmem>>, vector<8x256xf32>,
    %c1 = arith.constant 1 : index
    %c0_43 = arith.constant 0 : index
    %c0_44 = arith.constant 0 : index
    %72 = vector.load %arg1[%c1, %c0_43, %c0_44] : memref<2x8x256xf32, #tpu.memory_space<vmem>>, vector<1x8x256xf32>
    %73 = vector.shape_cast %72 : vector<1x8x256xf32> to vector<8x256xf32>
    %c0_45 = arith.constant 0 : index
    %c128_46 = arith.constant 128 : index
    %74 = vector.load %arg4[%c0_45, %c128_46] : memref<8x512xf32, #tpu.memory_space<vmem>>, vector<8x256xf32>
    tpu.vector_store %arg4[%c0_45, %c128_46], %73 {strides = array<i32>} : memref<8x512xf32, #tpu.memory_space<vmem>>, vector<8x256xf32>,
    %c0_47 = arith.constant 0 : index
    %c111_48 = arith.constant 111 : index
    %75 = vector.load %arg4[%c0_47, %c111_48] : memref<8x512xf32, #tpu.memory_space<vmem>>, vector<8x256xf32>
    %cst_49 = arith.constant 0.000000e+00 : f32
    %76 = vector.broadcast %cst_49 : f32 to vector<8x256xf32>
    %77 = arith.select %25, %75, %76 : vector<8x256xi1>, vector<8x256xf32>
    %c0_50 = arith.constant 0 : index
    %c256 = arith.constant 256 : index
    %78 = vector.load %arg5[%c0_50, %c256] : memref<72x512xf32, #tpu.memory_space<vmem>>, vector<8x256xf32>
    tpu.vector_store %arg5[%c0_50, %c256], %77 {strides = array<i32>} : memref<72x512xf32, #tpu.memory_space<vmem>>, vector<8x256xf32>,
    %c0_51 = arith.constant 0 : index
    %c112_52 = arith.constant 112 : index
    %79 = vector.load %arg4[%c0_51, %c112_52] : memref<8x512xf32, #tpu.memory_space<vmem>>, vector<8x256xf32>
    %c8_53 = arith.constant 8 : index
    %c256_54 = arith.constant 256 : index
    %80 = vector.load %arg5[%c8_53, %c256_54] : memref<72x512xf32, #tpu.memory_space<vmem>>, vector<8x256xf32>
    tpu.vector_store %arg5[%c8_53, %c256_54], %79 {strides = array<i32>} : memref<72x512xf32, #tpu.memory_space<vmem>>, vector<8x256xf32>,
    %c0_55 = arith.constant 0 : index
    %c113_56 = arith.constant 113 : index
    %81 = vector.load %arg4[%c0_55, %c113_56] : memref<8x512xf32, #tpu.memory_space<vmem>>, vector<8x256xf32>
    %cst_57 = arith.constant 0.000000e+00 : f32
    %82 = vector.broadcast %cst_57 : f32 to vector<8x256xf32>
    %83 = arith.select %34, %81, %82 : vector<8x256xi1>, vector<8x256xf32>
    %c16_58 = arith.constant 16 : index
    %c256_59 = arith.constant 256 : index
    %84 = vector.load %arg5[%c16_58, %c256_59] : memref<72x512xf32, #tpu.memory_space<vmem>>, vector<8x256xf32>
    tpu.vector_store %arg5[%c16_58, %c256_59], %83 {strides = array<i32>} : memref<72x512xf32, #tpu.memory_space<vmem>>, vector<8x256xf32>,
    %c0_60 = arith.constant 0 : index
    %c127_61 = arith.constant 127 : index
    %85 = vector.load %arg4[%c0_60, %c127_61] : memref<8x512xf32, #tpu.memory_space<vmem>>, vector<8x256xf32>
    %cst_62 = arith.constant 0.000000e+00 : f32
    %86 = vector.broadcast %cst_62 : f32 to vector<8x256xf32>
    %87 = arith.select %25, %85, %86 : vector<8x256xi1>, vector<8x256xf32>
    %c24_63 = arith.constant 24 : index
    %c256_64 = arith.constant 256 : index
    %88 = vector.load %arg5[%c24_63, %c256_64] : memref<72x512xf32, #tpu.memory_space<vmem>>, vector<8x256xf32>
    tpu.vector_store %arg5[%c24_63, %c256_64], %87 {strides = array<i32>} : memref<72x512xf32, #tpu.memory_space<vmem>>, vector<8x256xf32>,
    %c0_65 = arith.constant 0 : index
    %c128_66 = arith.constant 128 : index
    %89 = vector.load %arg4[%c0_65, %c128_66] : memref<8x512xf32, #tpu.memory_space<vmem>>, vector<8x256xf32>
    %c32_67 = arith.constant 32 : index
    %c256_68 = arith.constant 256 : index
    %90 = vector.load %arg5[%c32_67, %c256_68] : memref<72x512xf32, #tpu.memory_space<vmem>>, vector<8x256xf32>
    tpu.vector_store %arg5[%c32_67, %c256_68], %89 {strides = array<i32>} : memref<72x512xf32, #tpu.memory_space<vmem>>, vector<8x256xf32>,
    %c0_69 = arith.constant 0 : index
    %c129_70 = arith.constant 129 : index
    %91 = vector.load %arg4[%c0_69, %c129_70] : memref<8x512xf32, #tpu.memory_space<vmem>>, vector<8x256xf32>
    %cst_71 = arith.constant 0.000000e+00 : f32
    %92 = vector.broadcast %cst_71 : f32 to vector<8x256xf32>
    %93 = arith.select %34, %91, %92 : vector<8x256xi1>, vector<8x256xf32>
    %c40_72 = arith.constant 40 : index
    %c256_73 = arith.constant 256 : index
    %94 = vector.load %arg5[%c40_72, %c256_73] : memref<72x512xf32, #tpu.memory_space<vmem>>, vector<8x256xf32>
    tpu.vector_store %arg5[%c40_72, %c256_73], %93 {strides = array<i32>} : memref<72x512xf32, #tpu.memory_space<vmem>>, vector<8x256xf32>,
    %c0_74 = arith.constant 0 : index
    %c143_75 = arith.constant 143 : index
    %95 = vector.load %arg4[%c0_74, %c143_75] : memref<8x512xf32, #tpu.memory_space<vmem>>, vector<8x256xf32>
    %cst_76 = arith.constant 0.000000e+00 : f32
    %96 = vector.broadcast %cst_76 : f32 to vector<8x256xf32>
    %97 = arith.select %25, %95, %96 : vector<8x256xi1>, vector<8x256xf32>
    %c48_77 = arith.constant 48 : index
    %c256_78 = arith.constant 256 : index
    %98 = vector.load %arg5[%c48_77, %c256_78] : memref<72x512xf32, #tpu.memory_space<vmem>>, vector<8x256xf32>
    tpu.vector_store %arg5[%c48_77, %c256_78], %97 {strides = array<i32>} : memref<72x512xf32, #tpu.memory_space<vmem>>, vector<8x256xf32>,
    %c0_79 = arith.constant 0 : index
    %c144_80 = arith.constant 144 : index
    %99 = vector.load %arg4[%c0_79, %c144_80] : memref<8x512xf32, #tpu.memory_space<vmem>>, vector<8x256xf32>
    %c56_81 = arith.constant 56 : index
    %c256_82 = arith.constant 256 : index
    %100 = vector.load %arg5[%c56_81, %c256_82] : memref<72x512xf32, #tpu.memory_space<vmem>>, vector<8x256xf32>
    tpu.vector_store %arg5[%c56_81, %c256_82], %99 {strides = array<i32>} : memref<72x512xf32, #tpu.memory_space<vmem>>, vector<8x256xf32>,
    %c0_83 = arith.constant 0 : index
    %c145_84 = arith.constant 145 : index
    %101 = vector.load %arg4[%c0_83, %c145_84] : memref<8x512xf32, #tpu.memory_space<vmem>>, vector<8x256xf32>
    %cst_85 = arith.constant 0.000000e+00 : f32
    %102 = vector.broadcast %cst_85 : f32 to vector<8x256xf32>
    %103 = arith.select %34, %101, %102 : vector<8x256xi1>, vector<8x256xf32>
    %c64_86 = arith.constant 64 : index
    %c256_87 = arith.constant 256 : index
    %104 = vector.load %arg5[%c64_86, %c256_87] : memref<72x512xf32, #tpu.memory_space<vmem>>, vector<8x256xf32>
    tpu.vector_store %arg5[%c64_86, %c256_87], %103 {strides = array<i32>} : memref<72x512xf32, #tpu.memory_space<vmem>>, vector<8x256xf32>,
    %c0_88 = arith.constant 0 : index
    %c0_89 = arith.constant 0 : index
    %105 = vector.load %arg2[%c0_88, %c0_89] : memref<4x72xf32, #tpu.memory_space<vmem>>, vector<4x72xf32>
    %c0_90 = arith.constant 0 : index
    %c0_91 = arith.constant 0 : index
    %106 = vector.load %arg5[%c0_90, %c0_91] : memref<72x512xf32, #tpu.memory_space<vmem>>, vector<72x512xf32>
    %cst_92 = arith.constant dense<0.000000e+00> : vector<4x512xf32>
    %107 = tpu.matmul %105, %106, %cst_92 {dimension_numbers = #tpu.dot_dimension_numbers<[1], [0], [0], [1], [0, 0, 1, 1], [], []>} : vector<4x72xf32>, vector<72x512xf32>, vector<4x512xf32> -> vector<4x512xf32>
    %108 = vector.extract_strided_slice %107 {offsets = [0, 0], sizes = [4, 256], strides = [1, 1]} : vector<4x512xf32> to vector<4x256xf32>
    %c0_93 = arith.constant 0 : index
    %c0_94 = arith.constant 0 : index
    %c0_95 = arith.constant 0 : index
    %109 = vector.load %arg3[%c0_93, %c0_94, %c0_95] : memref<2x4x256xf32, #tpu.memory_space<vmem>>, vector<1x4x256xf32>
    %110 = vector.shape_cast %109 : vector<1x4x256xf32> to vector<4x256xf32>
    %111 = vector.shape_cast %108 : vector<4x256xf32> to vector<1x4x256xf32>
    tpu.vector_store %arg3[%c0_93, %c0_94, %c0_95], %111 {strides = array<i32>} : memref<2x4x256xf32, #tpu.memory_space<vmem>>, vector<1x4x256xf32>,
    %112 = vector.extract_strided_slice %107 {offsets = [0, 256], sizes = [4, 256], strides = [1, 1]} : vector<4x512xf32> to vector<4x256xf32>
    %c1_96 = arith.constant 1 : index
    %c0_97 = arith.constant 0 : index
    %c0_98 = arith.constant 0 : index
    %113 = vector.load %arg3[%c1_96, %c0_97, %c0_98] : memref<2x4x256xf32, #tpu.memory_space<vmem>>, vector<1x4x256xf32>
    %114 = vector.shape_cast %113 : vector<1x4x256xf32> to vector<4x256xf32>
    %115 = vector.shape_cast %112 : vector<4x256xf32> to vector<1x4x256xf32>
    tpu.vector_store %arg3[%c1_96, %c0_97, %c0_98], %115 {strides = array<i32>} : memref<2x4x256xf32, #tpu.memory_space<vmem>>, vector<1x4x256xf32>,
    return
  }
  func.func @transform_0(%arg0: i32) -> (i32, i32, i32) {
    %c0_i32 = arith.constant 0 : i32
    %c0_i32_0 = arith.constant 0 : i32
    %c0_i32_1 = arith.constant 0 : i32
    return %arg0, %c0_i32, %c0_i32_0 : i32, i32, i32
  }
  func.func @transform_1(%arg0: i32) -> (i32, i32) {
    %c0_i32 = arith.constant 0 : i32
    %c0_i32_0 = arith.constant 0 : i32
    %c0_i32_1 = arith.constant 0 : i32
    return %c0_i32, %c0_i32_0 : i32, i32
  }
  func.func @transform_2(%arg0: i32) -> (i32, i32, i32) {
    %c0_i32 = arith.constant 0 : i32
    %c0_i32_0 = arith.constant 0 : i32
    %c0_i32_1 = arith.constant 0 : i32
    return %arg0, %c0_i32, %c0_i32_0 : i32, i32, i32
  }
}

</mosaic_0001>

<bundles_post_ra>
// kernel: tpu_custom_call.1
= control target key start
LH: loop header
LB: loop body
LE: loop exit
PB: predicated region body
PF: predicated region fallthrough
CT: control target
= control target key end

     0   :  { %7 = vsyncpa [#allocation5], 0  ;;  %s1098_s0 = inlined_call_operand.hbm [shape: f32[2,8,256], index: 0, kind: input, shape index: {}]   ;;  %s1099_s1 = inlined_call_operand.hbm [shape: f32[4,72], index: 1, kind: input, shape index: {}]   ;;  %s1100_s2 = inlined_call_operand.hbm [shape: f32[2,4,256], index: 2, kind: output, shape index: {}]  }
   0x1   :  { %8 = vsyncpa [#allocation8], 0 }
   0x2   :  { %9 = vsyncpa [#allocation6], 0  ;;  %s904_s9 = smov [#allocation4]   ;;  %s832_s13 = scalar_lea.hbm %s1098_s0, 512 }
   0x3   :  { %s15_s10 = sshll.u32 %s904_s9, 4  ;;  %p833_p0 = scmp.ne.s32.totalorder %s1098_s0, %s832_s13  ;;  %s16_s10 = int_to_ptr.vmem [resolvable:$true] %s15_s10 }
   0x4   :  { %p836_p1 = scmp.lt.u32.totalorder %s832_s13, %s1098_s0 }
   0x6   :  { %p838_p2 = pnand %p836_p1, %p833_p0 }
   0x8   :  { %841 = shalt.err (!%p838_p2)
}
   0x9   :  { %s842_s18 = scalar_lea.vmem %s16_s10, 512  ;;  %p847_p4 = scmp.lt.s32.totalorder %s16_s10, %s16_s10 }
   0xa   :  { %p843_p3 = scmp.ne.s32.totalorder %s16_s10, %s842_s18  ;;  %p848_p5 = scmp.lt.s32.totalorder %s842_s18, %s842_s18 }
   0xc   :  { %p849_p6 = por %p848_p5, %p847_p4 }
   0xe   :  { %p850_p7 = pnand %p849_p6, %p843_p3 }
  0x10   :  { %853 = shalt.err (!%p850_p7)
}
  0x11   :  { %s905_s19 = smov 256   ;;  %s906_s20 = smov 16  }
  0x12   :  { %21 = dma.hbm_to_vmem [thread:$0]  %s1098_s0, 512, %s16_s10, [#allocation5], %s905_s19, %s905_s19, %s906_s20  }
  0x13   :  { %s907_s23 = smov [#allocation7]   ;;  %s854_s27 = scalar_lea.hbm %s1099_s1, 64 }
  0x14   :  { %s28_s24 = sshll.u32 %s907_s23, 4  ;;  %p855_p8 = scmp.ne.s32.totalorder %s1099_s1, %s854_s27  ;;  %s29_s24 = int_to_ptr.vmem [resolvable:$true] %s28_s24 }
  0x15   :  { %p858_p9 = scmp.lt.u32.totalorder %s854_s27, %s1099_s1 }
  0x17   :  { %p860_p10 = pnand %p858_p9, %p855_p8 }
  0x19   :  { %863 = shalt.err (!%p860_p10)
}
  0x1a   :  { %s864_s4 = scalar_lea.vmem %s29_s24, 64  ;;  %p869_p12 = scmp.lt.s32.totalorder %s29_s24, %s29_s24 }
  0x1b   :  { %p865_p11 = scmp.ne.s32.totalorder %s29_s24, %s864_s4  ;;  %p870_p13 = scmp.lt.s32.totalorder %s864_s4, %s864_s4 }
  0x1d   :  { %p871_p0 = por %p870_p13, %p869_p12 }
  0x1f   :  { %p872_p1 = pnand %p871_p0, %p865_p11 }
  0x21   :  { %875 = shalt.err (!%p872_p1)
}
  0x22   :  { %31 = dma.hbm_to_vmem [thread:$0]  %s1099_s1, 64, %s29_s24, [#allocation8]  }
  0x23   :  { %898 = dma.done.wait [#allocation5], 512  }
  0x24   :  { %899 = vsyncadd [#allocation5], 4294966784 }
  0x25   :  { %900 = dma.done.wait [#allocation8], 64  }
  0x26   :  { %901 = vsyncadd [#allocation8], 4294967232  ;;  %v908_v0 = vmov 0.0   ;;  %s909_s6 = smov 17   ;;  %v961_v1 = vld [vmem:[#allocation4 + $0x10] sm:$0xff]  ;;  %v963_v2 = vld [vmem:[#allocation4 + $0x18] sm:$0xff]  ;;  %v38_v10 = vlaneseq }
  0x27   :  { %525 = vmatprep.mubr.f32.mxu0 %v908_v0  ;;  %596 = vmatprep.mubr.f32.mxu1 %v908_v0  ;;  %v965_v3 = vld [vmem:[#allocation4] sm:$0xff]  ;;  %v742_v4 = vpack.i.bf16 %v963_v2, %v961_v1  ;;  %v969_v5 = vld [vmem:[#allocation4 + $0x8] sm:$0xff]  ;;  %s910_s1 = smov 1   ;;  %s911_s7 = smov 15   ;;  %v787_v7 = vpack.i.bf16 %v908_v0, %v963_v2  ;;  %vm160_vm0 = vcmask 7168   ;;  %vm99_vm1 = vcmask 138240  }
  0x28   :  { %728 = vrot.lane.b32.xlu1 %v908_v0, %s906_s20  ;;  %723 = vrot.lane.b32.xlu0 %v908_v0, %s909_s6  ;;  %v732_v6 = vpack.i.bf16 %v969_v5, %v965_v3  ;;  %v782_v8 = vpack.i.bf16 %v908_v0, %v969_v5  ;;  %s912_s8 = smov 127   ;;  %v792_v9 = vpack.i.bf16 %v961_v1, %v965_v3  ;;  %s913_s9 = smov 113   ;;  %v983_v11 = vand.u32 127, %v38_v10 }
  0x29   :  { %s914_s10 = smov 112   ;;  %s915_s11 = smov 111   ;;  %vm120_vm2 = vcmask 130048   ;;  %vm139_vm3 = vcmask 121856   ;;  %vm916_vm7 = vmmov 1   ;;  %vm185_vm12 = vcmask 1039360  }
  0x2a   :  { %v40_v12 = vadd.s32 128, %v983_v11  ;;  %v45_v15 = vand.u32 15, %v983_v11  ;;  %s917_s12 = smov [#allocation9]  }
  0x2b   :  { %s619_s13 = sshll.u32 %s917_s12, 4  ;;  %s620_s13 = int_to_ptr.vmem [resolvable:$true] %s619_s13 }
  0x2c   :  { %743 = vrot.lane.b32.xlu1 %v742_v4, %s909_s6  ;;  %733 = vrot.lane.b32.xlu0 %v732_v6, %s909_s6  ;;  %v52_v16 = vand.u32 15, %v40_v12  ;;  %v987_v17 = vadd.s32 4294967295, %v45_v15  ;;  %s876_s14 = scalar_lea.vmem %s620_s13, 256  ;;  %p881_p3 = scmp.lt.s32.totalorder %s620_s13, %s620_s13 }
  0x2d   :  { %p877_p2 = scmp.ne.s32.totalorder %s620_s13, %s876_s14  ;;  %p882_p4 = scmp.lt.s32.totalorder %s876_s14, %s876_s14 }
  0x2e   :  { %v66_v19 = vadd.s32 4294967295, %v52_v16  ;;  %v989_v20 = vadd.s32 1, %v52_v16  ;;  %vm67_vm4 = vcmp.ge.s32.totalorder %v987_v17, 0 }
  0x2f   :  { %vm1010_vm9 = vmpackc.low %vm916_vm7, %vm67_vm4  ;;  %p883_p5 = por %p882_p4, %p881_p3 }
  0x30   :  { %748 = vrot.lane.b32.xlu1 %v742_v4, %s906_s20  ;;  %738 = vrot.lane.b32.xlu0 %v732_v6, %s906_s20  ;;  %vm68_vm5 = vcmp.ge.s32.totalorder %v66_v19, 0  ;;  %vm78_vm6 = vcmp.lt.s32.totalorder %v989_v20, 16 }
  0x31   :  { %vm998_vm8 = vmpackc.low %vm916_vm7, %vm68_vm5  ;;  %p884_p6 = pnand %p883_p5, %p877_p2 }
  0x32   :  { %vm1027_vm10 = vmpackc.low %vm68_vm5, %vm78_vm6 }
  0x33   :  { %vm671_vm14 = vmpackc.low %vm78_vm6, %vm916_vm7 }
  0x34   :  { %758 = vrot.lane.b32.xlu1 %v732_v6, %s910_s1  ;;  %753 = vrot.lane.b32.xlu0 %v732_v6, %s911_s7 }
  0x38   :  { %768 = vrot.lane.b32.xlu1 %v742_v4, %s910_s1  ;;  %763 = vrot.lane.b32.xlu0 %v742_v4, %s911_s7 }
  0x3c   :  { %778 = vrot.lane.b32.xlu1 %v908_v0, %s910_s1  ;;  %773 = vrot.lane.b32.xlu0 %v908_v0, %s911_s7 }
  0x40   :  { %788 = vrot.lane.b32.xlu1 %v787_v7, %s912_s8  ;;  %783 = vrot.lane.b32.xlu0 %v782_v8, %s912_s8 }
  0x44   :  { %798 = vrot.lane.b32.xlu1 %v782_v8, %s913_s9  ;;  %793 = vrot.lane.b32.xlu0 %v792_v9, %s912_s8 }
  0x48   :  { %808 = vrot.lane.b32.xlu1 %v787_v7, %s913_s9  ;;  %803 = vrot.lane.b32.xlu0 %v782_v8, %s914_s10 }
  0x4c   :  { %818 = vrot.lane.b32.xlu1 %v792_v9, %s913_s9  ;;  %813 = vrot.lane.b32.xlu0 %v787_v7, %s914_s10 }
  0x50   :  { %242 = vrot.lane.b32.xlu1 %v969_v5, %s915_s11  ;;  %823 = vrot.lane.b32.xlu0 %v792_v9, %s914_s10 }
  0x54   :  { %408 = vrot.lane.b32.xlu1 %v963_v2, %s915_s11  ;;  %828 = vrot.lane.b32.xlu0 %v908_v0, %s915_s11  ;;  %v1031_v0 = vadd.s32 1, %v45_v15 }
  0x56   :  { %vm77_vm11 = vcmp.lt.s32.totalorder %v1031_v0, 16 }
  0x57   :  { %vm668_vm13 = vmpackc.low %vm67_vm4, %vm77_vm11 }
  0x58   :  { %406 = vrot.lane.b32.xlu1 %v961_v1, %s915_s11  ;;  %240 = vrot.lane.b32.xlu0 %v965_v3, %s915_s11  ;;  %vm674_vm15 = vmpackc.low %vm77_vm11, %vm916_vm7 }
  0x9a   :  { %v729_v13 = vpop.permute.xlu1 %728  ;;  %v724_v14 = vpop.permute.xlu0 %723 }
  0x9b   :  { %v731_v26 = vunpack.i.h.bf16 %v729_v13  ;;  %v726_v27 = vunpack.i.h.bf16 %v724_v14  ;;  %v730_v29 = vunpack.i.l.bf16 %v729_v13  ;;  %v725_v30 = vunpack.i.l.bf16 %v724_v14 }
  0x9e   :  { %v744_v18 = vpop.permute.xlu1 %743  ;;  %v734_v21 = vpop.permute.xlu0 %733 }
  0x9f   :  { %v746_v22 = vunpack.i.h.bf16 %v744_v18  ;;  %v745_v23 = vunpack.i.l.bf16 %v744_v18  ;;  %v736_v24 = vunpack.i.h.bf16 %v734_v21  ;;  %v735_v25 = vunpack.i.l.bf16 %v734_v21 }
  0xa1   :  { %v273_v36 = vsel %vm99_vm1, %v745_v23, %v746_v22  ;;  %v272_v37 = vsel %vm99_vm1, %v726_v27, %v745_v23  ;;  %v101_v38 = vsel %vm99_vm1, %v735_v25, %v736_v24  ;;  %v100_v41 = vsel %vm99_vm1, %v725_v30, %v735_v25 }
  0xa2   :  { %v749_v28 = vpop.permute.xlu1 %748  ;;  %v739_v33 = vpop.permute.xlu0 %738  ;;  %vm227_vm1 = vcmask 916480  }
  0xa3   :  { %v751_v31 = vunpack.i.h.bf16 %v749_v28  ;;  %v750_v32 = vunpack.i.l.bf16 %v749_v28  ;;  %v741_v34 = vunpack.i.h.bf16 %v739_v33  ;;  %v740_v35 = vunpack.i.l.bf16 %v739_v33 }
  0xa5   :  { %v293_v40 = vsel %vm120_vm2, %v750_v32, %v751_v31  ;;  %v292_v42 = vsel %vm120_vm2, %v731_v26, %v750_v32  ;;  %v122_v44 = vsel %vm120_vm2, %v740_v35, %v741_v34  ;;  %v121_v46 = vsel %vm120_vm2, %v730_v29, %v740_v35 }
  0xa6   :  { %v759_v43 = vpop.permute.xlu1 %758  ;;  %v682_v45 = vpack.c.bf16 %v293_v40, %v273_v36  ;;  %v685_v48 = vpack.c.bf16 %v292_v42, %v272_v37  ;;  %v754_v51 = vpop.permute.xlu0 %753  ;;  %v658_v52 = vpack.c.bf16 %v122_v44, %v101_v38  ;;  %v661_v53 = vpack.c.bf16 %v121_v46, %v100_v41 }
  0xa7   :  { %v761_v49 = vunpack.i.h.bf16 %v759_v43  ;;  %v760_v50 = vunpack.i.l.bf16 %v759_v43  ;;  %v756_v54 = vunpack.i.h.bf16 %v754_v51  ;;  %v755_v55 = vunpack.i.l.bf16 %v754_v51 }
  0xa8   :  { %684 = vmatprep.subr.msk.bf16.mxu1 %vm998_vm8, %v682_v45  ;;  %660 = vmatprep.subr.msk.bf16.mxu0 %vm998_vm8, %v658_v52  ;;  %vm246_vm2 = vcmask 908288  }
  0xa9   :  { %v162_v56 = vsel %vm160_vm0, %v760_v50, %v761_v49  ;;  %687 = vmatpush1.bf16.msk.msra.mxu1 %vm1010_vm9, %v685_v48  ;;  %v141_v57 = vsel %vm139_vm3, %v755_v55, %v756_v54  ;;  %663 = vmatpush1.bf16.msk.msra.mxu0 %vm1010_vm9, %v661_v53 }
  0xaa   :  { %v769_v58 = vpop.permute.xlu1 %768  ;;  %v664_v60 = vpack.c.bf16 %v162_v56, %v141_v57  ;;  %v764_v63 = vpop.permute.xlu0 %763 }
  0xab   :  { %v771_v61 = vunpack.i.h.bf16 %v769_v58  ;;  %v770_v62 = vunpack.i.l.bf16 %v769_v58  ;;  %v766_v4 = vunpack.i.h.bf16 %v764_v63  ;;  %v765_v6 = vunpack.i.l.bf16 %v764_v63 }
  0xac   :  { %666 = vmatprep.subr.msk.bf16.mxu0 %vm1027_vm10, %v664_v60 }
  0xad   :  { %v331_v7 = vsel %vm160_vm0, %v770_v62, %v771_v61  ;;  %v311_v8 = vsel %vm139_vm3, %v765_v6, %v766_v4 }
  0xae   :  { %v779_v9 = vpop.permute.xlu1 %778  ;;  %v688_v10 = vpack.c.bf16 %v331_v7, %v311_v8  ;;  %v774_v13 = vpop.permute.xlu0 %773 }
  0xaf   :  { %v781_v11 = vunpack.i.h.bf16 %v779_v9  ;;  %v780_v12 = vunpack.i.l.bf16 %v779_v9  ;;  %v776_v14 = vunpack.i.h.bf16 %v774_v13  ;;  %v775_v16 = vunpack.i.l.bf16 %v774_v13 }
  0xb0   :  { %690 = vmatprep.subr.msk.bf16.mxu1 %vm1027_vm10, %v688_v10 }
  0xb1   :  { %v161_v15 = vsel %vm160_vm0, %v780_v12, %v760_v50  ;;  %v330_v18 = vsel %vm160_vm0, %v781_v11, %v770_v62  ;;  %v140_v19 = vsel %vm139_vm3, %v775_v16, %v755_v55  ;;  %v310_v21 = vsel %vm139_vm3, %v776_v14, %v765_v6 }
  0xb2   :  { %v789_v22 = vpop.permute.xlu1 %788  ;;  %v667_v23 = vpack.c.bf16 %v161_v15, %v140_v19  ;;  %v691_v24 = vpack.c.bf16 %v330_v18, %v310_v21  ;;  %v784_v27 = vpop.permute.xlu0 %783  ;;  %vm206_vm0 = vcmask 924672   ;;  %v420_v19 = vld [vmem:[#allocation7] sm:$0xf]  ;;  %vm457_vm3 = vcmask 588800  }
  0xb3   :  { %v791_v25 = vunpack.i.h.bf16 %v789_v22  ;;  %v790_v26 = vunpack.i.l.bf16 %v789_v22  ;;  %v786_v28 = vunpack.i.h.bf16 %v784_v27  ;;  %v785_v29 = vunpack.i.l.bf16 %v784_v27 }
  0xb4   :  { %669 = vmatpush1.bf16.msk.msra.mxu0 %vm668_vm13, %v667_v23  ;;  %693 = vmatpush1.bf16.msk.msra.mxu1 %vm668_vm13, %v691_v24 }
  0xb5   :  { %v355_v30 = vsel %vm185_vm12, %v790_v26, %v791_v25  ;;  %v187_v17 = vsel %vm185_vm12, %v785_v29, %v786_v28 }
  0xb6   :  { %v694_v31 = vpack.c.bf16 %v355_v30, %v963_v2  ;;  %v799_v32 = vpop.permute.xlu1 %798  ;;  %v670_v33 = vpack.c.bf16 %v187_v17, %v969_v5  ;;  %v794_v34 = vpop.permute.xlu0 %793 }
  0xb7   :  { %v796_v35 = vunpack.i.h.bf16 %v794_v34  ;;  %v795_v36 = vunpack.i.l.bf16 %v794_v34  ;;  %v801_v37 = vunpack.i.h.bf16 %v799_v32  ;;  %v800_v38 = vunpack.i.l.bf16 %v799_v32 }
  0xb8   :  { %696 = vmatprep.subr.msk.bf16.mxu1 %vm671_vm14, %v694_v31  ;;  %672 = vmatprep.subr.msk.bf16.mxu0 %vm671_vm14, %v670_v33 }
  0xb9   :  { %v354_v40 = vsel %vm185_vm12, %v796_v35, %v790_v26  ;;  %v186_v41 = vsel %vm185_vm12, %v795_v36, %v785_v29  ;;  %v208_v46 = vsel %vm206_vm0, %v800_v38, %v801_v37 }
  0xba   :  { %v809_v42 = vpop.permute.xlu1 %808  ;;  %v697_v2 = vpack.c.bf16 %v354_v40, %v961_v1  ;;  %v673_v5 = vpack.c.bf16 %v186_v41, %v965_v3  ;;  %v804_v43 = vpop.permute.xlu0 %803 }
  0xbb   :  { %v806_v44 = vunpack.i.h.bf16 %v804_v43  ;;  %v805_v45 = vunpack.i.l.bf16 %v804_v43  ;;  %v811_v48 = vunpack.i.h.bf16 %v809_v42  ;;  %v810_v49 = vunpack.i.l.bf16 %v809_v42 }
  0xbc   :  { %675 = vmatpush1.bf16.msk.msra.mxu0 %vm674_vm15, %v673_v5  ;;  %699 = vmatpush1.bf16.msk.msra.mxu1 %vm674_vm15, %v697_v2 }
  0xbd   :  { %v229_v50 = vsel %vm227_vm1, %v805_v45, %v806_v44  ;;  %v375_v1 = vsel %vm206_vm0, %v810_v49, %v811_v48 }
  0xbe   :  { %v819_v51 = vpop.permute.xlu1 %818  ;;  %v676_v52 = vpack.c.bf16 %v229_v50, %v208_v46  ;;  %v814_v53 = vpop.permute.xlu0 %813 }
  0xbf   :  { %v816_v54 = vunpack.i.h.bf16 %v814_v53  ;;  %v815_v55 = vunpack.i.l.bf16 %v814_v53  ;;  %v821_v3 = vunpack.i.h.bf16 %v819_v51  ;;  %v820_v56 = vunpack.i.l.bf16 %v819_v51 }
  0xc0   :  { %678 = vmatprep.subr.msk.bf16.mxu0 %vm998_vm8, %v676_v52 }
  0xc1   :  { %v395_v57 = vsel %vm227_vm1, %v815_v55, %v816_v54  ;;  %v207_v63 = vsel %vm206_vm0, %v820_v56, %v800_v38  ;;  %v374_v4 = vsel %vm206_vm0, %v821_v3, %v810_v49 }
  0xc2   :  { %v243_v58 = vpop.permute.xlu1 %242  ;;  %v700_v59 = vpack.c.bf16 %v395_v57, %v375_v1  ;;  %v824_v60 = vpop.permute.xlu0 %823 }
  0xc3   :  { %v826_v61 = vunpack.i.h.bf16 %v824_v60  ;;  %v825_v62 = vunpack.i.l.bf16 %v824_v60 }
  0xc4   :  { %702 = vmatprep.subr.msk.bf16.mxu1 %vm998_vm8, %v700_v59 }
  0xc5   :  { %v228_v6 = vsel %vm227_vm1, %v825_v62, %v805_v45  ;;  %v394_v7 = vsel %vm227_vm1, %v826_v61, %v815_v55 }
  0xc6   :  { %v409_v8 = vpop.permute.xlu1 %408  ;;  %v679_v9 = vpack.c.bf16 %v228_v6, %v207_v63  ;;  %v703_v10 = vpack.c.bf16 %v394_v7, %v374_v4  ;;  %v829_v11 = vpop.permute.xlu0 %828 }
  0xc7   :  { %v831_v12 = vunpack.i.h.bf16 %v829_v11  ;;  %v830_v13 = vunpack.i.l.bf16 %v829_v11 }
  0xc8   :  { %681 = vmatpush1.bf16.msk.msra.mxu0 %vm1010_vm9, %v679_v9  ;;  %705 = vmatpush1.bf16.msk.msra.mxu1 %vm1010_vm9, %v703_v10 }
  0xc9   :  { %v248_v14 = vsel %vm246_vm2, %v243_v58, %v830_v13  ;;  %v413_v16 = vsel %vm246_vm2, %v409_v8, %v831_v12 }
  0xca   :  { %v407_v39 = vpop.permute.xlu1 %406  ;;  %v241_v18 = vpop.permute.xlu0 %240  ;;  %644 = vmatprep.subr.msk.mxu0 %vm78_vm6, %v248_v14  ;;  %656 = vmatprep.subr.msk.mxu1 %vm78_vm6, %v413_v16 }
  0xcb   :  { %v412_v15 = vsel %vm246_vm2, %v407_v39, %v409_v8  ;;  %v247_v21 = vsel %vm246_vm2, %v241_v18, %v243_v58 }
  0xcc   :  { %645 = vmatpush1.msk.msra.mxu0 %vm77_vm11, %v247_v21  ;;  %657 = vmatpush1.msk.msra.mxu1 %vm77_vm11, %v412_v15 }
  0xcd   :  { %632 = vmatmul.mubr.msk.f32.vlgmr.msra.gmra.mrb[0].mxu0 %vm457_vm3, %v420_v19  ;;  %633 = vmatmul.mubr.msk.f32.vlgmr.msra.gmra.mrb[0].mxu1 %vm457_vm3, %v420_v19 }
 0x1a0   :  { %v527_v47 = vpop.f32.mrb[0].mxu0  ;;  %v598_v22 = vpop.f32.mrb[0].mxu1 }
 0x1a1   :  { %v529_v23 = vpop.f32.mrb[1].mxu0  ;;  %v600_v24 = vpop.f32.mrb[1].mxu1 }
 0x1a2   :  { %v605_v20 = vcombine.low %v527_v47, %v529_v23  ;;  %v610_v25 = vcombine.low %v598_v22, %v600_v24 }
 0x1a4   :  { %607 = vst [vmem:[#allocation9] sm:$0xff] %v605_v20  ;;  %613 = vst [vmem:[#allocation9 + $0x8] sm:$0xff] %v610_v25 }
 0x1a5   :  { %887 = shalt.err (!%p884_p6)
}
 0x1a6   :  { %s888_s17 = scalar_lea.hbm %s1100_s2, 256 }
 0x1a7   :  { %p889_p7 = scmp.ne.s32.totalorder %s1100_s2, %s888_s17  ;;  %p892_p8 = scmp.lt.u32.totalorder %s888_s17, %s1100_s2 }
 0x1a9   :  { %p894_p9 = pnand %p892_p8, %p889_p7 }
 0x1ab   :  { %897 = shalt.err (!%p894_p9)
}
 0x1ac   :  { %s918_s22 = smov 128   ;;  %s919_s23 = smov 8  }
 0x1ad   :  { %625 = dma.vmem_to_hbm [thread:$0]  %s620_s13, 256, %s1100_s2, [#allocation6], %s918_s22, %s918_s22, %s919_s23  }
 0x1ae   :  { %902 = dma.done.wait [#allocation6], 256  }
 0x1af   :  { %903 = vsyncadd [#allocation6], 4294967040 }
 0x1b0   :  { %629 = vsyncpa [#allocation5], 1 }
 0x1b1   :  { %630 = vsyncpa [#allocation8], 1 }
 0x1b2   :  { %631 = vsyncpa [#allocation6], 1 }

</bundles_post_ra>
